<compile_context>
chip_gen: v6e
topology: v6e:2x2x1
jax: 0.10.0
libtpu: 0.0.40
codegen_flags: <defaults>
</compile_context>

<pallas_src>
import math
import jax
import jax.numpy as jnp
from jax.experimental import pallas as pl
from jax.experimental.pallas import tpu as pltpu


def _round_up(x: int, m: int) -> int:
    return ((x + m - 1) // m) * m


def _choose_block_rows(B: int, *, max_rows: int = 4096,
                       single_step_rows: int = 1024) -> int:
    """Pick the batch tile (rows per grid step).

    Small B  -> one step with block rows == B (full dim, no 8-alignment needed).
    Large B  -> >=2 steps (megacore on v7x), tiles capped at `max_rows` so the
                double-buffered x/out VMEM footprint stays well under the v5e
                16 MiB scoped-VMEM default.
    """
    if B <= single_step_rows:
        return B
    n_steps = max(2, pl.cdiv(B, max_rows))
    return _round_up(pl.cdiv(B, n_steps), 8)


def _linear_logsoftmax_kernel(x_ref, wt_ref, b_ref, o_ref):
    # x_ref: (TB, F) f32   wt_ref: (F, E) f32 (pre-transposed, K-on-sublanes)
    # b_ref: (1, E) f32    o_ref: (TB, E)
    logits = jnp.dot(x_ref[...], wt_ref[...],
                     preferred_element_type=jnp.float32) + b_ref[...]
    # Numerically stable log-softmax along the class axis (PyTorch dim=1).
    m = jnp.max(logits, axis=-1, keepdims=True)                  # (TB, 1)
    z = logits - m
    lse = jnp.log(jnp.sum(jnp.exp(z), axis=-1, keepdims=True))   # (TB, 1)
    o_ref[...] = (z - lse).astype(o_ref.dtype)


def linear_logsoftmax(x, weight, bias, *, max_block_rows: int = 4096,
                      single_step_rows: int = 1024,
                      out_dtype=jnp.float32):
    """x: (B, F); weight: (E, F) [PyTorch nn.Linear layout]; bias: (E,).

    Returns (B, E) log-probabilities matching
    torch.nn.LogSoftmax(dim=1)(nn.Linear(F, E)(x)).
    """
    x = x.astype(jnp.float32)
    weight = weight.astype(jnp.float32)
    bias = bias.astype(jnp.float32)

    B, F = x.shape
    E, F2 = weight.shape
    assert F == F2, "weight must be (env_num, factor_dim)"

    # One-time, tiny wrapper-side prep: (E, F) -> (F, E), bias -> (1, E).
    w_t = weight.T
    b2d = bias.reshape(1, E)

    tb = _choose_block_rows(B, max_rows=max_block_rows,
                            single_step_rows=single_step_rows)
    grid = (pl.cdiv(B, tb),)   # partial last block handled by Pallas masking

    return pl.pallas_call(
        _linear_logsoftmax_kernel,
        out_shape=jax.ShapeDtypeStruct((B, E), out_dtype),
        grid_spec=pltpu.PrefetchScalarGridSpec(
            num_scalar_prefetch=0,
            grid=grid,
            in_specs=[
                # x: tiled over batch, double-buffered by the Pallas pipeline.
                pl.BlockSpec((tb, F), lambda i: (i, 0)),
                # weight / bias: constant blocks, stay resident in VMEM.
                pl.BlockSpec((F, E), lambda i: (0, 0)),
                pl.BlockSpec((1, E), lambda i: (0, 0)),
            ],
            out_specs=pl.BlockSpec((tb, E), lambda i: (i, 0)),
        ),
        compiler_params=pltpu.CompilerParams(
            # Batch tiles are independent -> shard across TensorCores (v7x).
            dimension_semantics=("parallel",),
        ),
    )(x, w_t, b2d)


def init_params(key, factor_dim, env_num):
    """Matches the module __init__: xavier_uniform_ weight, default Linear bias."""
    kw, kb = jax.random.split(key)
    a = math.sqrt(6.0 / (factor_dim + env_num))          # xavier uniform bound
    weight = jax.random.uniform(
        kw, (env_num, factor_dim), jnp.float32, minval=-a, maxval=a)
    bb = 1.0 / math.sqrt(factor_dim)                     # default nn.Linear bias init
    bias = jax.random.uniform(kb, (env_num,), jnp.float32, minval=-bb, maxval=bb)
    return weight, bias


if __name__ == "__main__":
    key = jax.random.PRNGKey(0)
    k_x1, k_p1, k_x2, k_p2 = jax.random.split(key, 4)

    # --- Test 1: shapes consistent with the module's own example ------------
    # invariant_preferences = torch.randn(10, 100); env_num = 3.
    B1, F1, E1 = 10, 100, 3
    x1 = jax.random.normal(k_x1, (B1, F1), jnp.float32)
    w1, b1 = init_params(k_p1, F1, E1)
    out1 = jax.block_until_ready(linear_logsoftmax(x1, w1, b1))
    ref1 = jax.nn.log_softmax(x1 @ w1.T + b1, axis=1)
    assert out1.shape == (B1, E1)
    assert bool(jnp.all(jnp.isfinite(out1)))
    assert jnp.allclose(out1, ref1, atol=1e-5, rtol=1e-5)

    # --- Test 2: exercise the multi-step grid + masked partial last block ---
    B2, F2, E2 = 200, 40, 4
    x2 = jax.random.normal(k_x2, (B2, F2), jnp.float32)
    w2, b2 = init_params(k_p2, F2, E2)
    # Force multiple steps at small size: tb=56 -> grid=(4,), last block partial.
    out2 = jax.block_until_ready(
        linear_logsoftmax(x2, w2, b2, max_block_rows=64, single_step_rows=64))
    ref2 = jax.nn.log_softmax(x2 @ w2.T + b2, axis=1)
    assert out2.shape == (B2, E2)
    assert bool(jnp.all(jnp.isfinite(out2)))
    assert jnp.allclose(out2, ref2, atol=1e-5, rtol=1e-5)

    print("KERNEL_OK")
</pallas_src>

<mosaic_0001>
module attributes {stable_mosaic.version = 11 : i64} {
  func.func @_linear_logsoftmax_kernel(%arg0: i32, %arg1: memref<10x100xf32, #tpu.memory_space<vmem>>, %arg2: memref<100x3xf32, #tpu.memory_space<vmem>>, %arg3: memref<1x3xf32, #tpu.memory_space<vmem>>, %arg4: memref<10x3xf32, #tpu.memory_space<vmem>>) attributes {dimension_semantics = [#tpu.dimension_semantics<parallel>], iteration_bounds = array<i64: 1>, scalar_prefetch = 0 : i64, scratch_operands = 0 : i64, tpu.core_type = #tpu.core_type<tc>, window_params = [{transform_indices = @transform_0, window_bounds = array<i64: 10, 100>}, {pipeline_mode = #tpu.pipeline_mode<synchronous>, transform_indices = @transform_1, window_bounds = array<i64: 100, 3>}, {pipeline_mode = #tpu.pipeline_mode<synchronous>, transform_indices = @transform_2, window_bounds = array<i64: 1, 3>}, {transform_indices = @transform_3, window_bounds = array<i64: 10, 3>}]} {
    %c0 = arith.constant 0 : index
    %c0_0 = arith.constant 0 : index
    %0 = vector.load %arg1[%c0, %c0_0] : memref<10x100xf32, #tpu.memory_space<vmem>>, vector<10x100xf32>
    %c0_1 = arith.constant 0 : index
    %c0_2 = arith.constant 0 : index
    %1 = vector.load %arg2[%c0_1, %c0_2] : memref<100x3xf32, #tpu.memory_space<vmem>>, vector<100x3xf32>
    %cst = arith.constant dense<0.000000e+00> : vector<10x3xf32>
    %2 = tpu.matmul %0, %1, %cst {dimension_numbers = #tpu.dot_dimension_numbers<[1], [0], [0], [1], [0, 0, 1, 1], [], []>} : vector<10x100xf32>, vector<100x3xf32>, vector<10x3xf32> -> vector<10x3xf32>
    %c0_3 = arith.constant 0 : index
    %c0_4 = arith.constant 0 : index
    %3 = vector.load %arg3[%c0_3, %c0_4] : memref<1x3xf32, #tpu.memory_space<vmem>>, vector<1x3xf32>
    %4 = vector.broadcast %3 : vector<1x3xf32> to vector<10x3xf32>
    %5 = arith.addf %2, %4 : vector<10x3xf32>
    %cst_5 = arith.constant dense<0xFF800000> : vector<10xf32>
    %6 = vector.multi_reduction <maximumf>, %5, %cst_5 [1] : vector<10x3xf32> to vector<10xf32>
    %7 = vector.shape_cast %6 : vector<10xf32> to vector<10x1xf32>
    %8 = vector.broadcast %7 : vector<10x1xf32> to vector<10x3xf32>
    %9 = arith.subf %5, %8 : vector<10x3xf32>
    %10 = math.exp %9 : vector<10x3xf32>
    %cst_6 = arith.constant dense<0.000000e+00> : vector<10xf32>
    %11 = vector.multi_reduction <add>, %10, %cst_6 [1] : vector<10x3xf32> to vector<10xf32>
    %12 = vector.shape_cast %11 : vector<10xf32> to vector<10x1xf32>
    %13 = math.log %12 : vector<10x1xf32>
    %14 = vector.broadcast %13 : vector<10x1xf32> to vector<10x3xf32>
    %15 = arith.subf %9, %14 : vector<10x3xf32>
    %c0_7 = arith.constant 0 : index
    %c0_8 = arith.constant 0 : index
    %16 = vector.load %arg4[%c0_7, %c0_8] : memref<10x3xf32, #tpu.memory_space<vmem>>, vector<10x3xf32>
    tpu.vector_store %arg4[%c0_7, %c0_8], %15 {strides = array<i32>} : memref<10x3xf32, #tpu.memory_space<vmem>>, vector<10x3xf32>,
    return
  }
  func.func @transform_0(%arg0: i32) -> (i32, i32) {
    %c0_i32 = arith.constant 0 : i32
    %c0_i32_0 = arith.constant 0 : i32
    return %arg0, %c0_i32 : i32, i32
  }
  func.func @transform_1(%arg0: i32) -> (i32, i32) {
    %c0_i32 = arith.constant 0 : i32
    %c0_i32_0 = arith.constant 0 : i32
    %c0_i32_1 = arith.constant 0 : i32
    return %c0_i32, %c0_i32_0 : i32, i32
  }
  func.func @transform_2(%arg0: i32) -> (i32, i32) {
    %c0_i32 = arith.constant 0 : i32
    %c0_i32_0 = arith.constant 0 : i32
    %c0_i32_1 = arith.constant 0 : i32
    return %c0_i32, %c0_i32_0 : i32, i32
  }
  func.func @transform_3(%arg0: i32) -> (i32, i32) {
    %c0_i32 = arith.constant 0 : i32
    %c0_i32_0 = arith.constant 0 : i32
    return %arg0, %c0_i32 : i32, i32
  }
}

</mosaic_0001>

<bundles_post_ra>
// kernel: tpu_custom_call.1
= control target key start
LH: loop header
LB: loop body
LE: loop exit
PB: predicated region body
PF: predicated region fallthrough
CT: control target
= control target key end

     0   :  { %vm43_vm0 = vcmask 1043456   ;;  %vm36_vm1 = vcmask 818176   ;;  %vm122_vm2 = vcmask 23552   ;;  %vm126_vm3 = vcmask 17408   ;;  %s292_s1 = inlined_call_operand.vmem [shape: f32[100,3], index: 1, kind: input, shape index: {}]   ;;  %s293_s0 = inlined_call_operand.vmem [shape: f32[10,100], index: 0, kind: input, shape index: {}]   ;;  %s294_s2 = inlined_call_operand.vmem [shape: f32[1,3], index: 2, kind: input, shape index: {}]   ;;  %s295_s3 = inlined_call_operand.vmem [shape: f32[10,3], index: 3, kind: output, shape index: {}]  }
   0x1   :  { %v28_v0 = vld [vmem:[%s292_s1 + $0x60] sm:$0xf]  ;;  %v27_v1 = vld [vmem:[%s292_s1 + $0x58] sm:$0xff]  ;;  %v26_v2 = vld [vmem:[%s292_s1 + $0x50] sm:$0xff] }
   0x2   :  { %173 = vmatprep.subr.msk.mxu0 %vm43_vm0, %v28_v0  ;;  %v25_v3 = vld [vmem:[%s292_s1 + $0x48] sm:$0xff]  ;;  %v14_v4 = vld [vmem:[%s293_s0] sm:$0xff]  ;;  %v23_v6 = vld [vmem:[%s292_s1 + $0x38] sm:$0xff] }
   0x3   :  { %174 = vmatpush3.msk.msra.mxu0 %vm43_vm0, %v28_v0  ;;  %199 = vmatprep.mubr.msk.f32.mxu0 %vm36_vm1, %v14_v4  ;;  %v24_v5 = vld [vmem:[%s292_s1 + $0x40] sm:$0xff]  ;;  %v22_v7 = vld [vmem:[%s292_s1 + $0x30] sm:$0xff]  ;;  %v21_v8 = vld [vmem:[%s292_s1 + $0x28] sm:$0xff] }
   0x4   :  { %175 = vmatprep.subr.mxu0 %v27_v1  ;;  %v20_v9 = vld [vmem:[%s292_s1 + $0x20] sm:$0xff]  ;;  %v19_v10 = vld [vmem:[%s292_s1 + $0x18] sm:$0xff]  ;;  %v18_v11 = vld [vmem:[%s292_s1 + $0x10] sm:$0xff] }
   0x5   :  { %176 = vmatpush3.msra.mxu0 %v27_v1  ;;  %v17_v12 = vld [vmem:[%s292_s1 + $0x8] sm:$0xff]  ;;  %v16_v13 = vld [vmem:[%s292_s1] sm:$0xff] }
   0x6   :  { %177 = vmatprep.subr.mxu0 %v26_v2  ;;  %v15_v14 = vld [vmem:[%s293_s0 + $0x8] sm:$0x3]  ;;  %v154_v16 = vld [vmem:[%s294_s2] ss:$0 sm:$0xff] }
   0x7   :  { %178 = vmatpush3.msra.mxu0 %v26_v2 }
   0x8   :  { %179 = vmatprep.subr.mxu0 %v25_v3 }
   0x9   :  { %180 = vmatpush3.msra.mxu0 %v25_v3 }
   0xa   :  { %181 = vmatprep.subr.mxu0 %v24_v5 }
   0xb   :  { %182 = vmatpush3.msra.mxu0 %v24_v5 }
   0xc   :  { %183 = vmatprep.subr.mxu0 %v23_v6 }
   0xd   :  { %184 = vmatpush3.msra.mxu0 %v23_v6 }
   0xe   :  { %185 = vmatprep.subr.mxu0 %v22_v7 }
   0xf   :  { %186 = vmatpush3.msra.mxu0 %v22_v7 }
  0x10   :  { %187 = vmatprep.subr.mxu0 %v21_v8 }
  0x11   :  { %188 = vmatpush3.msra.mxu0 %v21_v8 }
  0x12   :  { %189 = vmatprep.subr.mxu0 %v20_v9 }
  0x13   :  { %190 = vmatpush3.msra.mxu0 %v20_v9 }
  0x14   :  { %191 = vmatprep.subr.mxu0 %v19_v10 }
  0x15   :  { %192 = vmatpush3.msra.mxu0 %v19_v10 }
  0x16   :  { %193 = vmatprep.subr.mxu0 %v18_v11 }
  0x17   :  { %194 = vmatpush3.msra.mxu0 %v18_v11 }
  0x18   :  { %195 = vmatprep.subr.mxu0 %v17_v12 }
  0x19   :  { %196 = vmatpush3.msra.mxu0 %v17_v12 }
  0x1a   :  { %197 = vmatprep.subr.mxu0 %v16_v13 }
  0x1b   :  { %198 = vmatpush3.msra.mxu0 %v16_v13 }
  0x1c   :  { %200 = vmatmul.mubr.msk.f32.vlgmr.msra.gmra.mxu0 %vm36_vm1, %v15_v14 }
  0xdc   :  { %v201_v15 = vpop.f32.mrf.mxu0 }
  0xdd   :  { %v119_v19 = vadd.f32 %v201_v15, %v154_v16 }
  0xde   :  { %v113_v17 = vpop.f32.mrf.mxu0 }
  0xdf   :  { %v114_v18 = vadd.f32 %v154_v16, %v113_v17  ;;  %v127_v21 = vsel %vm126_vm3, %v119_v19, -inf }
  0xe1   :  { %v123_v20 = vsel %vm122_vm2, %v114_v18, -inf }
  0xe2   :  { %124 = vmax.xlane.f32.xlu0 %v123_v20 }
  0xe6   :  { %128 = vmax.xlane.f32.xlu0 %v127_v21 }
 0x16b   :  { %v125_v22 = vpop.xlane.xlu0 %124 }
 0x16c   :  { %v130_v23 = vsub.f32 %v114_v18, %v125_v22 }
 0x16e   :  { %v132_v24 = vmul.f32 1.442695, %v130_v23 }
 0x16f   :  { %v129_v25 = vpop.xlane.xlu0 %128 }
 0x170   :  { %202 = vpow2.f32 %v132_v24  ;;  %v131_v26 = vsub.f32 %v119_v19, %v129_v25 }
 0x172   :  { %v134_v27 = vmul.f32 1.442695, %v131_v26 }
 0x174   :  { %204 = vpow2.f32 %v134_v27 }
 0x17d   :  { %v203_v28 = vpop.eup %202 }
 0x17e   :  { %v136_v29 = vsel %vm122_vm2, %v203_v28, 0.0 }
 0x17f   :  { %137 = vadd.xlane.f32.xlu1 %v136_v29 }
 0x181   :  { %v205_v30 = vpop.eup %204 }
 0x182   :  { %v139_v31 = vsel %vm126_vm3, %v205_v30, 0.0 }
 0x183   :  { %140 = vadd.xlane.f32.xlu1 %v139_v31 }
 0x208   :  { %v138_v32 = vpop.xlane.xlu1 %137 }
 0x209   :  { %206 = vlog2.f32 %v138_v32 }
 0x20c   :  { %v141_v33 = vpop.xlane.xlu1 %140 }
 0x20d   :  { %208 = vlog2.f32 %v141_v33 }
 0x216   :  { %v207_v34 = vpop.eup %206 }
 0x217   :  { %v143_v35 = vmul.f32 0.6931472, %v207_v34 }
 0x219   :  { %v146_v36 = vsub.f32 %v130_v23, %v143_v35 }
 0x21a   :  { %v209_v37 = vpop.eup %208 }
 0x21b   :  { %148 = vst.msk [vmem:[%s295_s3] sm:$0xff] %vm122_vm2, %v146_v36  ;;  %v145_v38 = vmul.f32 0.6931472, %v209_v37 }
 0x21d   :  { %v147_v39 = vsub.f32 %v131_v26, %v145_v38 }
 0x21f   :  { %149 = vst.msk [vmem:[%s295_s3 + $0x8] sm:$0x3] %vm126_vm3, %v147_v39 }

</bundles_post_ra>
